<compile_context>
chip_gen: v5e
topology: v5e:2x2
jax: 0.10.0
libtpu: 0.0.40
codegen_flags: <defaults>
</compile_context>

<pallas_src>
import numpy as np
import jax
import jax.numpy as jnp
from jax.experimental import pallas as pl
from jax.experimental.pallas import tpu as pltpu

HIDDEN = 128
LANE = 128
ROW_ALIGN = 16          # bf16 packs 16 rows per vreg sublane group
MAX_BATCH_TILE = 512    # max rows per grid block at large batch
SPLIT_THRESHOLD = 256   # above this, force >= 2 blocks (v7x has 2 TensorCores)


def _round_up(n, m):
    return ((n + m - 1) // m) * m


def _cdiv(a, b):
    return -(-a // b)


def _choose_tiling(batch):
    """Return (padded_batch, rows_per_block)."""
    b_min = _round_up(batch, ROW_ALIGN)
    if b_min <= SPLIT_THRESHOLD:
        # Single block: whole (small) batch in one grid step.
        return b_min, b_min
    # At least 2 blocks so megacore can split; tiles as large as possible
    # (<= MAX_BATCH_TILE) while keeping row padding minimal.
    n_blocks = max(2, _cdiv(b_min, MAX_BATCH_TILE))
    tm = _round_up(_cdiv(b_min, n_blocks), ROW_ALIGN)
    return tm * n_blocks, tm


def mlp_kernel(x_ref,
               w1_ref, b1_ref,
               w2_ref, b2_ref,
               w3_ref, b3_ref,
               w4_ref, b4_ref,
               out_ref):
    # Entire MLP hot path in-kernel: 4 bf16 MXU matmuls (f32 accum) + 3 VPU ReLUs.
    x = x_ref[...]  # bf16

    h = jnp.dot(x, w1_ref[...], preferred_element_type=jnp.float32) + b1_ref[...]
    h = jnp.maximum(h, 0.0).astype(jnp.bfloat16)

    h = jnp.dot(h, w2_ref[...], preferred_element_type=jnp.float32) + b2_ref[...]
    h = jnp.maximum(h, 0.0).astype(jnp.bfloat16)

    h = jnp.dot(h, w3_ref[...], preferred_element_type=jnp.float32) + b3_ref[...]
    h = jnp.maximum(h, 0.0).astype(jnp.bfloat16)

    logits = jnp.dot(h, w4_ref[...], preferred_element_type=jnp.float32) + b4_ref[...]
    out_ref[...] = logits.astype(out_ref.dtype)   # f32 accum, bf16 store (lane-dense)


def init_params(key, state_dim, action_dim):
    """PyTorch-style uniform(-1/sqrt(fan_in), 1/sqrt(fan_in)) init.

    Weights returned as f32 (in_features, out_features); biases as f32 (1, out_features).
    """
    dims = [state_dim, HIDDEN, HIDDEN, HIDDEN, action_dim]
    params = []
    for i in range(4):
        fan_in, fan_out = dims[i], dims[i + 1]
        key, kw, kb = jax.random.split(key, 3)
        bound = 1.0 / np.sqrt(fan_in)
        w = jax.random.uniform(kw, (fan_in, fan_out), jnp.float32, -bound, bound)
        b = jax.random.uniform(kb, (1, fan_out), jnp.float32, -bound, bound)
        params += [w, b]
    return tuple(params)


def pack_params(params, state_dim, action_dim):
    """Kernel-ready params: bf16 weights, f32 biases, K padded to 16, output lane-padded."""
    w1, b1, w2, b2, w3, b3, w4, b4 = params
    k_pad = _round_up(state_dim, ROW_ALIGN)       # 16 rows: matches bf16 sublane packing
    out_pad = _round_up(action_dim, LANE)         # lane-dense unmasked store

    w1p = jnp.zeros((k_pad, HIDDEN), jnp.float32).at[:state_dim, :].set(w1)
    w4p = jnp.zeros((HIDDEN, out_pad), jnp.float32).at[:, :action_dim].set(w4)
    b4p = jnp.zeros((1, out_pad), jnp.float32).at[:, :action_dim].set(b4)

    return (w1p.astype(jnp.bfloat16), b1,
            w2.astype(jnp.bfloat16), b2,
            w3.astype(jnp.bfloat16), b3,
            w4p.astype(jnp.bfloat16), b4p)


def net_forward(obs, packed_params, action_dim, state=None, info=None):
    """Pallas equivalent of Net.forward. Returns (logits, state)."""
    if info is None:
        info = {}
    w1, b1, w2, b2, w3, b3, w4, b4 = packed_params
    k_pad = w1.shape[0]
    out_pad = w4.shape[1]

    x = jnp.asarray(obs)
    batch = x.shape[0]
    # obs.view(batch, -1); cast to bf16 *before* padding (halves pad bytes).
    x = x.reshape(batch, -1).astype(jnp.bfloat16)
    state_dim = x.shape[1]

    b_pad, tm = _choose_tiling(batch)
    x = jnp.pad(x, ((0, b_pad - batch), (0, k_pad - state_dim)))

    bcast = lambda a: pl.BlockSpec(a.shape, lambda i: (0, 0))  # grid-invariant

    logits_pad = pl.pallas_call(
        mlp_kernel,
        out_shape=jax.ShapeDtypeStruct((b_pad, out_pad), jnp.bfloat16),
        grid=(b_pad // tm,),
        in_specs=[pl.BlockSpec((tm, k_pad), lambda i: (i, 0)),
                  bcast(w1), bcast(b1),
                  bcast(w2), bcast(b2),
                  bcast(w3), bcast(b3),
                  bcast(w4), bcast(b4)],
        out_specs=pl.BlockSpec((tm, out_pad), lambda i: (i, 0)),
        compiler_params=pltpu.CompilerParams(dimension_semantics=("parallel",)),
    )(x, w1, b1, w2, b2, w3, b3, w4, b4)

    # Padded rows / lanes carry garbage (bias through ReLU) — slice them off.
    logits = logits_pad[:batch, :action_dim].astype(jnp.float32)
    return logits, state


def reference_forward_f32(obs, params):
    """Pure-f32 JAX reference (matches PyTorch math)."""
    x = obs.reshape(obs.shape[0], -1)
    w1, b1, w2, b2, w3, b3, w4, b4 = params
    h = jnp.maximum(x @ w1 + b1, 0.0)
    h = jnp.maximum(h @ w2 + b2, 0.0)
    h = jnp.maximum(h @ w3 + b3, 0.0)
    return h @ w4 + b4


def reference_forward_bf16(obs, packed_params, action_dim):
    """Pure-JAX reference doing the same bf16-matmul / f32-accum / bf16-store math."""
    w1, b1, w2, b2, w3, b3, w4, b4 = packed_params
    batch = obs.shape[0]
    x = obs.reshape(batch, -1).astype(jnp.bfloat16)
    x = jnp.pad(x, ((0, 0), (0, w1.shape[0] - x.shape[1])))
    h = jnp.maximum(jnp.dot(x, w1, preferred_element_type=jnp.float32) + b1, 0.0)
    h = jnp.maximum(jnp.dot(h.astype(jnp.bfloat16), w2,
                            preferred_element_type=jnp.float32) + b2, 0.0)
    h = jnp.maximum(jnp.dot(h.astype(jnp.bfloat16), w3,
                            preferred_element_type=jnp.float32) + b3, 0.0)
    out = jnp.dot(h.astype(jnp.bfloat16), w4, preferred_element_type=jnp.float32) + b4
    out = out.astype(jnp.bfloat16).astype(jnp.float32)   # kernel stores bf16
    return out[:, :action_dim]


if __name__ == "__main__":
    key = jax.random.PRNGKey(0)
    key, k_obs, k_obs_big = jax.random.split(key, 3)

    state_shape = (4,)      # e.g. CartPole-like observation
    action_shape = (2,)
    batch = 8

    state_dim = int(np.prod(state_shape))
    action_dim = int(np.prod(action_shape))

    params = init_params(key, state_dim, action_dim)
    packed = pack_params(params, state_dim, action_dim)
    obs = jax.random.normal(k_obs, (batch,) + state_shape, dtype=jnp.float32)

    # Jit the wrapper so pad/cast/slice fuse with the pallas_call dispatch.
    fwd = jax.jit(lambda o: net_forward(o, packed, action_dim)[0])

    logits = jax.block_until_ready(fwd(obs))

    # Same-precision (bf16 matmuls, f32 accum, bf16 store) reference.
    ref_bf16 = reference_forward_bf16(obs, packed, action_dim)
    np.testing.assert_allclose(np.asarray(logits), np.asarray(ref_bf16),
                               rtol=1e-2, atol=1e-2)

    # Full-f32 reference: loose tolerance accounts for bf16 rounding.
    ref_f32 = reference_forward_f32(obs, params)
    np.testing.assert_allclose(np.asarray(logits), np.asarray(ref_f32),
                               rtol=2e-2, atol=2e-2)

    assert logits.shape == (batch, action_dim)

    # Exercise the multi-block (grid > 1, megacore-splittable) path.
    big_batch = 1024
    obs_big = jax.random.normal(k_obs_big, (big_batch,) + state_shape, dtype=jnp.float32)
    logits_big = jax.block_until_ready(fwd(obs_big))
    ref_big = reference_forward_bf16(obs_big, packed, action_dim)
    np.testing.assert_allclose(np.asarray(logits_big), np.asarray(ref_big),
                               rtol=1e-2, atol=1e-2)
    assert logits_big.shape == (big_batch, action_dim)

    # Module semantics: forward returns (logits, state) with state passed through.
    _, state_out = net_forward(obs, packed, action_dim, state=None)
    assert state_out is None

    print("KERNEL_OK")
</pallas_src>

<mosaic_0001>
module attributes {stable_mosaic.version = 11 : i64} {
  func.func @mlp_kernel(%arg0: i32, %arg1: memref<16x16xbf16, #tpu.memory_space<vmem>>, %arg2: memref<16x128xbf16, #tpu.memory_space<vmem>>, %arg3: memref<1x128xf32, #tpu.memory_space<vmem>>, %arg4: memref<128x128xbf16, #tpu.memory_space<vmem>>, %arg5: memref<1x128xf32, #tpu.memory_space<vmem>>, %arg6: memref<128x128xbf16, #tpu.memory_space<vmem>>, %arg7: memref<1x128xf32, #tpu.memory_space<vmem>>, %arg8: memref<128x128xbf16, #tpu.memory_space<vmem>>, %arg9: memref<1x128xf32, #tpu.memory_space<vmem>>, %arg10: memref<16x128xbf16, #tpu.memory_space<vmem>>) attributes {dimension_semantics = [#tpu.dimension_semantics<parallel>], iteration_bounds = array<i64: 1>, scalar_prefetch = 0 : i64, scratch_operands = 0 : i64, tpu.core_type = #tpu.core_type<tc>, window_params = [{transform_indices = @transform_0, window_bounds = array<i64: 16, 16>}, {pipeline_mode = #tpu.pipeline_mode<synchronous>, transform_indices = @transform_1, window_bounds = array<i64: 16, 128>}, {pipeline_mode = #tpu.pipeline_mode<synchronous>, transform_indices = @transform_2, window_bounds = array<i64: 1, 128>}, {pipeline_mode = #tpu.pipeline_mode<synchronous>, transform_indices = @transform_3, window_bounds = array<i64: 128, 128>}, {pipeline_mode = #tpu.pipeline_mode<synchronous>, transform_indices = @transform_4, window_bounds = array<i64: 1, 128>}, {pipeline_mode = #tpu.pipeline_mode<synchronous>, transform_indices = @transform_5, window_bounds = array<i64: 128, 128>}, {pipeline_mode = #tpu.pipeline_mode<synchronous>, transform_indices = @transform_6, window_bounds = array<i64: 1, 128>}, {pipeline_mode = #tpu.pipeline_mode<synchronous>, transform_indices = @transform_7, window_bounds = array<i64: 128, 128>}, {pipeline_mode = #tpu.pipeline_mode<synchronous>, transform_indices = @transform_8, window_bounds = array<i64: 1, 128>}, {transform_indices = @transform_9, window_bounds = array<i64: 16, 128>}]} {
    %c0 = arith.constant 0 : index
    %c0_0 = arith.constant 0 : index
    %0 = vector.load %arg1[%c0, %c0_0] : memref<16x16xbf16, #tpu.memory_space<vmem>>, vector<16x16xbf16>
    %c0_1 = arith.constant 0 : index
    %c0_2 = arith.constant 0 : index
    %1 = vector.load %arg2[%c0_1, %c0_2] : memref<16x128xbf16, #tpu.memory_space<vmem>>, vector<16x128xbf16>
    %cst = arith.constant dense<0.000000e+00> : vector<16x128xf32>
    %2 = tpu.matmul %0, %1, %cst {dimension_numbers = #tpu.dot_dimension_numbers<[1], [0], [0], [1], [0, 0, 1, 1], [], []>} : vector<16x16xbf16>, vector<16x128xbf16>, vector<16x128xf32> -> vector<16x128xf32>
    %c0_3 = arith.constant 0 : index
    %c0_4 = arith.constant 0 : index
    %3 = vector.load %arg3[%c0_3, %c0_4] : memref<1x128xf32, #tpu.memory_space<vmem>>, vector<1x128xf32>
    %4 = vector.broadcast %3 : vector<1x128xf32> to vector<16x128xf32>
    %5 = arith.addf %2, %4 : vector<16x128xf32>
    %cst_5 = arith.constant 0.000000e+00 : f32
    %6 = vector.broadcast %cst_5 : f32 to vector<16x128xf32>
    %7 = arith.maximumf %5, %6 : vector<16x128xf32>
    %8 = arith.truncf %7 : vector<16x128xf32> to vector<16x128xbf16>
    %c0_6 = arith.constant 0 : index
    %c0_7 = arith.constant 0 : index
    %9 = vector.load %arg4[%c0_6, %c0_7] : memref<128x128xbf16, #tpu.memory_space<vmem>>, vector<128x128xbf16>
    %cst_8 = arith.constant dense<0.000000e+00> : vector<16x128xf32>
    %10 = tpu.matmul %8, %9, %cst_8 {dimension_numbers = #tpu.dot_dimension_numbers<[1], [0], [0], [1], [0, 0, 1, 1], [], []>} : vector<16x128xbf16>, vector<128x128xbf16>, vector<16x128xf32> -> vector<16x128xf32>
    %c0_9 = arith.constant 0 : index
    %c0_10 = arith.constant 0 : index
    %11 = vector.load %arg5[%c0_9, %c0_10] : memref<1x128xf32, #tpu.memory_space<vmem>>, vector<1x128xf32>
    %12 = vector.broadcast %11 : vector<1x128xf32> to vector<16x128xf32>
    %13 = arith.addf %10, %12 : vector<16x128xf32>
    %cst_11 = arith.constant 0.000000e+00 : f32
    %14 = vector.broadcast %cst_11 : f32 to vector<16x128xf32>
    %15 = arith.maximumf %13, %14 : vector<16x128xf32>
    %16 = arith.truncf %15 : vector<16x128xf32> to vector<16x128xbf16>
    %c0_12 = arith.constant 0 : index
    %c0_13 = arith.constant 0 : index
    %17 = vector.load %arg6[%c0_12, %c0_13] : memref<128x128xbf16, #tpu.memory_space<vmem>>, vector<128x128xbf16>
    %cst_14 = arith.constant dense<0.000000e+00> : vector<16x128xf32>
    %18 = tpu.matmul %16, %17, %cst_14 {dimension_numbers = #tpu.dot_dimension_numbers<[1], [0], [0], [1], [0, 0, 1, 1], [], []>} : vector<16x128xbf16>, vector<128x128xbf16>, vector<16x128xf32> -> vector<16x128xf32>
    %c0_15 = arith.constant 0 : index
    %c0_16 = arith.constant 0 : index
    %19 = vector.load %arg7[%c0_15, %c0_16] : memref<1x128xf32, #tpu.memory_space<vmem>>, vector<1x128xf32>
    %20 = vector.broadcast %19 : vector<1x128xf32> to vector<16x128xf32>
    %21 = arith.addf %18, %20 : vector<16x128xf32>
    %cst_17 = arith.constant 0.000000e+00 : f32
    %22 = vector.broadcast %cst_17 : f32 to vector<16x128xf32>
    %23 = arith.maximumf %21, %22 : vector<16x128xf32>
    %24 = arith.truncf %23 : vector<16x128xf32> to vector<16x128xbf16>
    %c0_18 = arith.constant 0 : index
    %c0_19 = arith.constant 0 : index
    %25 = vector.load %arg8[%c0_18, %c0_19] : memref<128x128xbf16, #tpu.memory_space<vmem>>, vector<128x128xbf16>
    %cst_20 = arith.constant dense<0.000000e+00> : vector<16x128xf32>
    %26 = tpu.matmul %24, %25, %cst_20 {dimension_numbers = #tpu.dot_dimension_numbers<[1], [0], [0], [1], [0, 0, 1, 1], [], []>} : vector<16x128xbf16>, vector<128x128xbf16>, vector<16x128xf32> -> vector<16x128xf32>
    %c0_21 = arith.constant 0 : index
    %c0_22 = arith.constant 0 : index
    %27 = vector.load %arg9[%c0_21, %c0_22] : memref<1x128xf32, #tpu.memory_space<vmem>>, vector<1x128xf32>
    %28 = vector.broadcast %27 : vector<1x128xf32> to vector<16x128xf32>
    %29 = arith.addf %26, %28 : vector<16x128xf32>
    %30 = arith.truncf %29 : vector<16x128xf32> to vector<16x128xbf16>
    %c0_23 = arith.constant 0 : index
    %c0_24 = arith.constant 0 : index
    %31 = vector.load %arg10[%c0_23, %c0_24] : memref<16x128xbf16, #tpu.memory_space<vmem>>, vector<16x128xbf16>
    tpu.vector_store %arg10[%c0_23, %c0_24], %30 {strides = array<i32>} : memref<16x128xbf16, #tpu.memory_space<vmem>>, vector<16x128xbf16>,
    return
  }
  func.func @transform_0(%arg0: i32) -> (i32, i32) {
    %c0_i32 = arith.constant 0 : i32
    %c0_i32_0 = arith.constant 0 : i32
    return %arg0, %c0_i32 : i32, i32
  }
  func.func @transform_1(%arg0: i32) -> (i32, i32) {
    %c0_i32 = arith.constant 0 : i32
    %c0_i32_0 = arith.constant 0 : i32
    %c0_i32_1 = arith.constant 0 : i32
    return %c0_i32, %c0_i32_0 : i32, i32
  }
  func.func @transform_2(%arg0: i32) -> (i32, i32) {
    %c0_i32 = arith.constant 0 : i32
    %c0_i32_0 = arith.constant 0 : i32
    %c0_i32_1 = arith.constant 0 : i32
    return %c0_i32, %c0_i32_0 : i32, i32
  }
  func.func @transform_3(%arg0: i32) -> (i32, i32) {
    %c0_i32 = arith.constant 0 : i32
    %c0_i32_0 = arith.constant 0 : i32
    %c0_i32_1 = arith.constant 0 : i32
    return %c0_i32, %c0_i32_0 : i32, i32
  }
  func.func @transform_4(%arg0: i32) -> (i32, i32) {
    %c0_i32 = arith.constant 0 : i32
    %c0_i32_0 = arith.constant 0 : i32
    %c0_i32_1 = arith.constant 0 : i32
    return %c0_i32, %c0_i32_0 : i32, i32
  }
  func.func @transform_5(%arg0: i32) -> (i32, i32) {
    %c0_i32 = arith.constant 0 : i32
    %c0_i32_0 = arith.constant 0 : i32
    %c0_i32_1 = arith.constant 0 : i32
    return %c0_i32, %c0_i32_0 : i32, i32
  }
  func.func @transform_6(%arg0: i32) -> (i32, i32) {
    %c0_i32 = arith.constant 0 : i32
    %c0_i32_0 = arith.constant 0 : i32
    %c0_i32_1 = arith.constant 0 : i32
    return %c0_i32, %c0_i32_0 : i32, i32
  }
  func.func @transform_7(%arg0: i32) -> (i32, i32) {
    %c0_i32 = arith.constant 0 : i32
    %c0_i32_0 = arith.constant 0 : i32
    %c0_i32_1 = arith.constant 0 : i32
    return %c0_i32, %c0_i32_0 : i32, i32
  }
  func.func @transform_8(%arg0: i32) -> (i32, i32) {
    %c0_i32 = arith.constant 0 : i32
    %c0_i32_0 = arith.constant 0 : i32
    %c0_i32_1 = arith.constant 0 : i32
    return %c0_i32, %c0_i32_0 : i32, i32
  }
  func.func @transform_9(%arg0: i32) -> (i32, i32) {
    %c0_i32 = arith.constant 0 : i32
    %c0_i32_0 = arith.constant 0 : i32
    return %arg0, %c0_i32 : i32, i32
  }
}

</mosaic_0001>

<bundles_post_ra>
// kernel: _lambda_.1
= control target key start
LH: loop header
LB: loop body
LE: loop exit
PB: predicated region body
PF: predicated region fallthrough
CT: control target
= control target key end

     0   :  { %14 = vsyncpa [#allocation3], 0  ;;  %s688_s0 = inlined_call_operand.vmem [shape: bf16[16,16], index: 0, kind: input, shape index: {}]   ;;  %s689_s1 = inlined_call_operand.vmem [shape: bf16[16,128], index: 1, kind: input, shape index: {}]   ;;  %s690_s2 = inlined_call_operand.vmem [shape: f32[1,128], index: 2, kind: input, shape index: {}]   ;;  %s691_s3 = inlined_call_operand.hbm [shape: bf16[128,128], index: 3, kind: input, shape index: {}]   ;;  %s692_s4 = inlined_call_operand.vmem [shape: f32[1,128], index: 4, kind: input, shape index: {}]   ;;  %s693_s5 = inlined_call_operand.hbm [shape: bf16[128,128], index: 5, kind: input, shape index: {}]   ;;  %s694_s6 = inlined_call_operand.vmem [shape: f32[1,128], index: 6, kind: input, shape index: {}]   ;;  %s695_s7 = inlined_call_operand.hbm [shape: bf16[128,128], index: 7, kind: input, shape index: {}]   ;;  %s696_s8 = inlined_call_operand.vmem [shape: f32[1,128], index: 8, kind: input, shape index: {}]   ;;  %s697_s9 = inlined_call_operand.vmem [shape: bf16[16,128], index: 9, kind: output, shape index: {}]  }
   0x1   :  { %15 = vsyncpa [#allocation5], 0  ;;  %s41_s11 = sshll.u32 %s693_s5, 4  ;;  %s603_s12 = smov [#allocation4]   ;;  %s42_s11 = int_to_ptr.hbm [resolvable:$true] %s41_s11 }
   0x2   :  { %s43_s13 = sshll.u32 %s603_s12, 4  ;;  %s26_s16 = sshll.u32 %s691_s3, 4  ;;  %s44_s13 = int_to_ptr.vmem [resolvable:$true] %s43_s13  ;;  %s27_s16 = int_to_ptr.hbm [resolvable:$true] %s26_s16 }
   0x3   :  { %s604_s17 = smov 64   ;;  %s605_s18 = smov 4  }
   0x4   :  { %49 = dma.hbm_to_vmem [thread:$0]  %s42_s11, 1024, %s44_s13, [#allocation5], %s604_s17, %s604_s17, %s605_s18  }
   0x5   :  { %s606_s19 = smov [#allocation2]   ;;  %s56_s23 = sshll.u32 %s695_s7, 4  ;;  %s57_s23 = int_to_ptr.hbm [resolvable:$true] %s56_s23 }
   0x6   :  { %s28_s20 = sshll.u32 %s606_s19, 4  ;;  %s607_s5 = smov [#allocation6]   ;;  %s29_s20 = int_to_ptr.vmem [resolvable:$true] %s28_s20 }
   0x7   :  { %34 = dma.hbm_to_vmem [thread:$0]  %s27_s16, 1024, %s29_s20, [#allocation3], %s604_s17, %s604_s17, %s605_s18  }
   0x8   :  { %s58_s24 = sshll.u32 %s607_s5, 4  ;;  %s59_s24 = int_to_ptr.vmem [resolvable:$true] %s58_s24 }
   0x9   :  { %64 = dma.hbm_to_vmem [thread:$0]  %s57_s23, 1024, %s59_s24, [#allocation5], %s604_s17, %s604_s17, %s605_s18  }
   0xa   :  { %599 = dma.done.wait [#allocation3], 1024  }
   0xb   :  { %600 = vsyncadd [#allocation3], 4294966272 }
   0xc   :  { %601 = dma.done.wait [#allocation5], 2048  }
   0xd   :  { %602 = vsyncadd [#allocation5], 4294965248  ;;  %v488_v0 = vld [vmem:[%s689_s1] sm:$0xff]  ;;  %v496_v1 = vld [vmem:[#allocation2 + $0x38] sm:$0xff]  ;;  %vm99_vm0 = vcmask 130048  }
   0xe   :  { %v487_v2 = vld [vmem:[%s688_s0] sm:$0xff]  ;;  %110 = vmatpush.bf16.msra.mxu0 %v488_v0  ;;  %188 = vmatpush.bf16.msra.mxu1 %v496_v1  ;;  %v495_v3 = vld [vmem:[#allocation2 + $0x30] sm:$0xff]  ;;  %v494_v4 = vld [vmem:[#allocation2 + $0x28] sm:$0xff] }
   0xf   :  { %v493_v5 = vld [vmem:[#allocation2 + $0x20] sm:$0xff]  ;;  %v492_v6 = vld [vmem:[#allocation2 + $0x18] sm:$0xff]  ;;  %v491_v7 = vld [vmem:[#allocation2 + $0x10] sm:$0xff] }
  0x10   :  { %v490_v8 = vld [vmem:[#allocation2 + $0x8] sm:$0xff]  ;;  %v489_v9 = vld [vmem:[#allocation2] sm:$0xff]  ;;  %v504_v10 = vld [vmem:[#allocation4 + $0x38] sm:$0xff] }
  0x11   :  { %390 = vmatmul.msk.bf16.vlgmr.msra.gmra.mxu0 %vm99_vm0, %v487_v2  ;;  %273 = vmatpush.bf16.msra.mxu2 %v504_v10  ;;  %v503_v11 = vld [vmem:[#allocation4 + $0x30] sm:$0xff]  ;;  %v502_v12 = vld [vmem:[#allocation4 + $0x28] sm:$0xff]  ;;  %v501_v13 = vld [vmem:[#allocation4 + $0x20] sm:$0xff] }
  0x12   :  { %189 = vmatpush.bf16.msra.mxu1 %v495_v3  ;;  %v523_v15 = vld [vmem:[%s690_s2] ss:$0 sm:$0xff]  ;;  %v500_v22 = vld [vmem:[#allocation4 + $0x18] sm:$0xff]  ;;  %v499_v23 = vld [vmem:[#allocation4 + $0x10] sm:$0xff] }
  0x13   :  { %v498_v24 = vld [vmem:[#allocation4 + $0x8] sm:$0xff]  ;;  %v497_v25 = vld [vmem:[#allocation4] sm:$0xff]  ;;  %v512_v26 = vld [vmem:[#allocation6 + $0x38] sm:$0xff] }
  0x14   :  { %358 = vmatpush.bf16.msra.mxu3 %v512_v26  ;;  %v511_v27 = vld [vmem:[#allocation6 + $0x30] sm:$0xff]  ;;  %v510_v28 = vld [vmem:[#allocation6 + $0x28] sm:$0xff]  ;;  %v509_v29 = vld [vmem:[#allocation6 + $0x20] sm:$0xff] }
  0x15   :  { %274 = vmatpush.bf16.msra.mxu2 %v503_v11  ;;  %v524_v31 = vld [vmem:[%s692_s4] ss:$0 sm:$0xff]  ;;  %v508_v38 = vld [vmem:[#allocation6 + $0x18] sm:$0xff]  ;;  %v507_v39 = vld [vmem:[#allocation6 + $0x10] sm:$0xff] }
  0x16   :  { %190 = vmatpush.bf16.msra.mxu1 %v494_v4  ;;  %v506_v40 = vld [vmem:[#allocation6 + $0x8] sm:$0xff]  ;;  %v505_v41 = vld [vmem:[#allocation6] sm:$0xff] }
  0x17   :  { %v525_v43 = vld [vmem:[%s694_s6] ss:$0 sm:$0xff] }
  0x18   :  { %359 = vmatpush.bf16.msra.mxu3 %v511_v27  ;;  %v526_v51 = vld [vmem:[%s696_s8] ss:$0 sm:$0xff] }
  0x19   :  { %275 = vmatpush.bf16.msra.mxu2 %v502_v12 }
  0x1a   :  { %191 = vmatpush.bf16.msra.mxu1 %v493_v5 }
  0x1c   :  { %360 = vmatpush.bf16.msra.mxu3 %v510_v28 }
  0x1d   :  { %276 = vmatpush.bf16.msra.mxu2 %v501_v13 }
  0x1e   :  { %192 = vmatpush.bf16.msra.mxu1 %v492_v6 }
  0x20   :  { %361 = vmatpush.bf16.msra.mxu3 %v509_v29 }
  0x21   :  { %277 = vmatpush.bf16.msra.mxu2 %v500_v22 }
  0x22   :  { %193 = vmatpush.bf16.msra.mxu1 %v491_v7 }
  0x24   :  { %362 = vmatpush.bf16.msra.mxu3 %v508_v38 }
  0x25   :  { %278 = vmatpush.bf16.msra.mxu2 %v499_v23 }
  0x26   :  { %194 = vmatpush.bf16.msra.mxu1 %v490_v8 }
  0x28   :  { %363 = vmatpush.bf16.msra.mxu3 %v507_v39 }
  0x29   :  { %279 = vmatpush.bf16.msra.mxu2 %v498_v24 }
  0x2a   :  { %195 = vmatpush.bf16.msra.mxu1 %v489_v9 }
  0x2c   :  { %364 = vmatpush.bf16.msra.mxu3 %v506_v40 }
  0x2d   :  { %280 = vmatpush.bf16.msra.mxu2 %v497_v25 }
  0x30   :  { %365 = vmatpush.bf16.msra.mxu3 %v505_v41 }
  0x8e   :  { %v112_v14 = vpop.f32.mrf.mxu0 }
  0x8f   :  { %v113_v16 = vadd.f32 %v523_v15, %v112_v14 }
  0x91   :  { %v117_v19 = vmax.f32 %v113_v16, 0.0 }
  0x96   :  { %v114_v17 = vpop.f32.mrf.mxu0 }
  0x97   :  { %v115_v18 = vadd.f32 %v523_v15, %v114_v17 }
  0x99   :  { %v118_v20 = vmax.f32 %v115_v18, 0.0 }
  0x9b   :  { %v119_v21 = vpack.c.bf16 %v118_v20, %v117_v19 }
  0x9d   :  { %196 = vmatmul.bf16.vlgmr.msra.gmra.mxu1 %v119_v21 }
 0x11a   :  { %v197_v30 = vpop.f32.mrf.mxu1 }
 0x11b   :  { %v198_v32 = vadd.f32 %v524_v31, %v197_v30 }
 0x11d   :  { %v202_v35 = vmax.f32 %v198_v32, 0.0 }
 0x122   :  { %v199_v33 = vpop.f32.mrf.mxu1 }
 0x123   :  { %v200_v34 = vadd.f32 %v524_v31, %v199_v33 }
 0x125   :  { %v203_v36 = vmax.f32 %v200_v34, 0.0 }
 0x127   :  { %v204_v37 = vpack.c.bf16 %v203_v36, %v202_v35 }
 0x129   :  { %281 = vmatmul.bf16.vlgmr.msra.gmra.mxu2 %v204_v37 }
 0x1ac   :  { %v282_v42 = vpop.f32.mrf.mxu2 }
 0x1ad   :  { %v283_v44 = vadd.f32 %v525_v43, %v282_v42 }
 0x1af   :  { %v287_v47 = vmax.f32 %v283_v44, 0.0 }
 0x1b4   :  { %v284_v45 = vpop.f32.mrf.mxu2 }
 0x1b5   :  { %v285_v46 = vadd.f32 %v525_v43, %v284_v45 }
 0x1b7   :  { %v288_v48 = vmax.f32 %v285_v46, 0.0 }
 0x1b9   :  { %v289_v49 = vpack.c.bf16 %v288_v48, %v287_v47 }
 0x1bb   :  { %366 = vmatmul.bf16.vlgmr.msra.gmra.mxu3 %v289_v49 }
 0x23e   :  { %v367_v50 = vpop.f32.mrf.mxu3 }
 0x23f   :  { %v368_v53 = vadd.f32 %v526_v51, %v367_v50 }
 0x246   :  { %v369_v52 = vpop.f32.mrf.mxu3 }
 0x247   :  { %v370_v54 = vadd.f32 %v526_v51, %v369_v52 }
 0x249   :  { %v516_v55 = vpack.c.bf16 %v370_v54, %v368_v53 }
 0x24b   :  { %517 = vst [vmem:[%s697_s9] sm:$0xff] %v516_v55  }
 0x24c   :  { %380 = vsyncpa [#allocation3], 1 }
 0x24d   :  { %381 = vsyncpa [#allocation5], 1 }

</bundles_post_ra>
